<compile_context>
chip_gen: v6e
topology: v6e:2x2x1
jax: 0.10.0
libtpu: 0.0.40
codegen_flags: <defaults>
</compile_context>

<pallas_src>
import jax
import jax.numpy as jnp
from jax.experimental import pallas as pl
from jax.experimental.pallas import tpu as pltpu

LANE = 128  # TPU lane width


def _round_up(x, m):
    return (x + m - 1) // m * m


def _gemm_bias_relu_kernel(x_ref, w_ref, b_ref, o_ref):
    """One row-tile of the im2col GEMM.

    x_ref : (tm, kc_pad)       bf16  im2col rows (K taps folded, lane-padded)
    w_ref : (kc_pad, c_out_p)  bf16  folded conv weights
    b_ref : (1, c_out_p)       f32   bias (folded BatchNorm shift)
    o_ref : (tm, c_out_p)      bf16  lane-dense output tile
    """
    acc = jnp.dot(x_ref[...], w_ref[...],
                  preferred_element_type=jnp.float32)   # MXU, f32 accumulate
    acc = jnp.maximum(acc + b_ref[...], 0.0)            # fused bias + ReLU (f32)
    o_ref[...] = acc.astype(o_ref.dtype)                # single unmasked bf16 store


def conv1d_bn_relu(x_ncl, weight, bias, *, tm_max=512):
    """x_ncl: (N, C_in, L) f32; weight: (K, C_in, C_out) f32; bias: (C_out,) f32.

    Returns (N, C_out, L) f32, matching PyTorch Conv1d('same') + bias + ReLU
    (with bf16 MXU operands / bf16 output rounding).
    """
    n, c_in, seq_len = x_ncl.shape
    kernel_size, _, c_out = weight.shape
    assert kernel_size % 2 == 1, "'same' padding assumes an odd kernel size"
    pad = kernel_size // 2

    rows = n * seq_len
    kc = kernel_size * c_in                  # folded contraction depth
    kc_pad = _round_up(kc, LANE)             # pad the FOLDED contraction once
    c_out_p = _round_up(c_out, LANE)

    # Row tile: multiple of 8, up to tm_max; pad rows to a tile multiple.
    tm = min(tm_max, _round_up(rows, 8))
    rows_pad = _round_up(rows, tm)

    # Boundary layout pass (fused by XLA): NCL -> NLC, 'same' halo pad, im2col
    # with the K taps folded into the last (contraction) axis, single lane pad.
    # TODO(synk): a real ECG backbone would keep lane-padded NLC bf16
    # activations end-to-end and avoid this per-block boundary pass entirely.
    x_nlc = jnp.transpose(x_ncl, (0, 2, 1))
    x_halo = jnp.pad(x_nlc, ((0, 0), (pad, pad), (0, 0)))
    xcol = jnp.concatenate(
        [x_halo[:, k:k + seq_len, :] for k in range(kernel_size)], axis=-1
    ).reshape(rows, kc)
    xcol = jnp.pad(
        xcol, ((0, rows_pad - rows), (0, kc_pad - kc))
    ).astype(jnp.bfloat16)

    # (K, C_in, C_out) -> (K*C_in, C_out), pad contraction + output lanes once.
    w2d = jnp.pad(
        weight.reshape(kc, c_out), ((0, kc_pad - kc), (0, c_out_p - c_out))
    ).astype(jnp.bfloat16)
    # Padded output channels stay zero only because the bias pad is zero — a
    # folded BatchNorm shift must also be zero-padded here (it is).
    b2d = jnp.pad(bias, (0, c_out_p - c_out)).reshape(1, c_out_p).astype(jnp.float32)

    grid = (rows_pad // tm,)
    cost = pl.CostEstimate(
        flops=2 * rows_pad * kc_pad * c_out_p,
        transcendentals=0,
        bytes_accessed=(xcol.size * 2 + w2d.size * 2 + b2d.size * 4
                        + rows_pad * c_out_p * 2),
    )

    out = pl.pallas_call(
        _gemm_bias_relu_kernel,
        out_shape=jax.ShapeDtypeStruct((rows_pad, c_out_p), jnp.bfloat16),
        grid_spec=pltpu.PrefetchScalarGridSpec(
            num_scalar_prefetch=0,
            grid=grid,
            in_specs=[
                pl.BlockSpec((tm, kc_pad), lambda i: (i, 0)),
                pl.BlockSpec((kc_pad, c_out_p), lambda i: (0, 0)),
                pl.BlockSpec((1, c_out_p), lambda i: (0, 0)),
            ],
            out_specs=pl.BlockSpec((tm, c_out_p), lambda i: (i, 0)),
        ),
        compiler_params=pltpu.CompilerParams(
            # Row tiles are independent -> pipelined DMA + megacore on v7x.
            dimension_semantics=("parallel",),
        ),
        cost_estimate=cost,
    )(xcol, w2d, b2d)

    # Drop row/channel padding, back to PyTorch NCL layout; cast to f32 only
    # at the module boundary (kernel writeback stays bf16).
    out = out[:rows, :c_out].reshape(n, seq_len, c_out)
    return jnp.transpose(out, (0, 2, 1)).astype(jnp.float32)


if __name__ == "__main__":
    key = jax.random.PRNGKey(0)
    k_x, k_w, k_b = jax.random.split(key, 3)

    # Small shapes consistent with a 1D-ECG conv block: batch=2, C_in=4, L=16.
    batch, c_in, seq_len = 2, 4, 16
    kernel_size, c_out = 3, 8

    x = jax.random.normal(k_x, (batch, c_in, seq_len), dtype=jnp.float32)
    weight = 0.1 * jax.random.normal(
        k_w, (kernel_size, c_in, c_out), dtype=jnp.float32
    )
    bias = 0.01 * jax.random.normal(k_b, (c_out,), dtype=jnp.float32)

    out = conv1d_bn_relu(x, weight, bias)
    jax.block_until_ready(out)

    # Plain-JAX reference with the same bf16 rounding of MXU operands
    # (accumulation in f32) and bf16 output rounding.
    pad = kernel_size // 2
    x_nlc = jnp.transpose(x, (0, 2, 1))
    x_pad = jnp.pad(x_nlc, ((0, 0), (pad, pad), (0, 0)))
    x_pad = x_pad.astype(jnp.bfloat16).astype(jnp.float32)
    w_f = weight.astype(jnp.bfloat16).astype(jnp.float32)
    ref = jnp.zeros((batch, seq_len, c_out), jnp.float32)
    for k in range(kernel_size):
        ref = ref + jnp.einsum("nlc,co->nlo", x_pad[:, k:k + seq_len, :], w_f[k])
    ref = jnp.maximum(ref + bias, 0.0)
    ref = jnp.transpose(ref, (0, 2, 1))
    ref = ref.astype(jnp.bfloat16).astype(jnp.float32)
    assert jnp.allclose(out, ref, atol=1e-2, rtol=1e-2), "mismatch vs reference"

    print("KERNEL_OK")
</pallas_src>

<mosaic_0001>
module attributes {stable_mosaic.version = 11 : i64} {
  func.func @_gemm_bias_relu_kernel(%arg0: i32, %arg1: memref<32x128xbf16, #tpu.memory_space<vmem>>, %arg2: memref<128x128xbf16, #tpu.memory_space<vmem>>, %arg3: memref<1x128xf32, #tpu.memory_space<vmem>>, %arg4: memref<32x128xbf16, #tpu.memory_space<vmem>>) attributes {dimension_semantics = [#tpu.dimension_semantics<parallel>], iteration_bounds = array<i64: 1>, scalar_prefetch = 0 : i64, scratch_operands = 0 : i64, tpu.core_type = #tpu.core_type<tc>, window_params = [{transform_indices = @transform_0, window_bounds = array<i64: 32, 128>}, {pipeline_mode = #tpu.pipeline_mode<synchronous>, transform_indices = @transform_1, window_bounds = array<i64: 128, 128>}, {pipeline_mode = #tpu.pipeline_mode<synchronous>, transform_indices = @transform_2, window_bounds = array<i64: 1, 128>}, {transform_indices = @transform_3, window_bounds = array<i64: 32, 128>}]} {
    %c0 = arith.constant 0 : index
    %c0_0 = arith.constant 0 : index
    %0 = vector.load %arg1[%c0, %c0_0] : memref<32x128xbf16, #tpu.memory_space<vmem>>, vector<32x128xbf16>
    %c0_1 = arith.constant 0 : index
    %c0_2 = arith.constant 0 : index
    %1 = vector.load %arg2[%c0_1, %c0_2] : memref<128x128xbf16, #tpu.memory_space<vmem>>, vector<128x128xbf16>
    %cst = arith.constant dense<0.000000e+00> : vector<32x128xf32>
    %2 = tpu.matmul %0, %1, %cst {dimension_numbers = #tpu.dot_dimension_numbers<[1], [0], [0], [1], [0, 0, 1, 1], [], []>} : vector<32x128xbf16>, vector<128x128xbf16>, vector<32x128xf32> -> vector<32x128xf32>
    %c0_3 = arith.constant 0 : index
    %c0_4 = arith.constant 0 : index
    %3 = vector.load %arg3[%c0_3, %c0_4] : memref<1x128xf32, #tpu.memory_space<vmem>>, vector<1x128xf32>
    %4 = vector.broadcast %3 : vector<1x128xf32> to vector<32x128xf32>
    %5 = arith.addf %2, %4 : vector<32x128xf32>
    %cst_5 = arith.constant 0.000000e+00 : f32
    %6 = vector.broadcast %cst_5 : f32 to vector<32x128xf32>
    %7 = arith.maximumf %5, %6 : vector<32x128xf32>
    %8 = arith.truncf %7 : vector<32x128xf32> to vector<32x128xbf16>
    %c0_6 = arith.constant 0 : index
    %c0_7 = arith.constant 0 : index
    %9 = vector.load %arg4[%c0_6, %c0_7] : memref<32x128xbf16, #tpu.memory_space<vmem>>, vector<32x128xbf16>
    tpu.vector_store %arg4[%c0_6, %c0_7], %8 {strides = array<i32>} : memref<32x128xbf16, #tpu.memory_space<vmem>>, vector<32x128xbf16>,
    return
  }
  func.func @transform_0(%arg0: i32) -> (i32, i32) {
    %c0_i32 = arith.constant 0 : i32
    %c0_i32_0 = arith.constant 0 : i32
    return %arg0, %c0_i32 : i32, i32
  }
  func.func @transform_1(%arg0: i32) -> (i32, i32) {
    %c0_i32 = arith.constant 0 : i32
    %c0_i32_0 = arith.constant 0 : i32
    %c0_i32_1 = arith.constant 0 : i32
    return %c0_i32, %c0_i32_0 : i32, i32
  }
  func.func @transform_2(%arg0: i32) -> (i32, i32) {
    %c0_i32 = arith.constant 0 : i32
    %c0_i32_0 = arith.constant 0 : i32
    %c0_i32_1 = arith.constant 0 : i32
    return %c0_i32, %c0_i32_0 : i32, i32
  }
  func.func @transform_3(%arg0: i32) -> (i32, i32) {
    %c0_i32 = arith.constant 0 : i32
    %c0_i32_0 = arith.constant 0 : i32
    return %arg0, %c0_i32 : i32, i32
  }
}

</mosaic_0001>

<bundles_post_ra>
// kernel: tpu_custom_call.1
= control target key start
LH: loop header
LB: loop body
LE: loop exit
PB: predicated region body
PF: predicated region fallthrough
CT: control target
= control target key end

     0   :  { %8 = vsyncpa [#allocation3], 0  ;;  %s409_s0 = inlined_call_operand.hbm [shape: bf16[32,128], index: 0, kind: input, shape index: {}]   ;;  %s410_s1 = inlined_call_operand.hbm [shape: bf16[128,128], index: 1, kind: input, shape index: {}]   ;;  %s411_s2 = inlined_call_operand.vmem [shape: f32[1,128], index: 2, kind: input, shape index: {}]   ;;  %s412_s3 = inlined_call_operand.hbm [shape: bf16[32,128], index: 3, kind: output, shape index: {}]  }
   0x1   :  { %9 = vsyncpa [#allocation6], 0 }
   0x2   :  { %10 = vsyncpa [#allocation4], 0  ;;  %s363_s12 = smov [#allocation2]  }
   0x3   :  { %s16_s13 = sshll.u32 %s363_s12, 4  ;;  %s17_s13 = int_to_ptr.vmem [resolvable:$true] %s16_s13 }
   0x4   :  { %s305_s14 = scalar_lea.vmem %s17_s13, 256  ;;  %p310_p1 = scmp.lt.s32.totalorder %s17_s13, %s17_s13 }
   0x5   :  { %p306_p0 = scmp.ne.s32.totalorder %s17_s13, %s305_s14  ;;  %p311_p2 = scmp.lt.s32.totalorder %s305_s14, %s305_s14 }
   0x7   :  { %p312_p3 = por %p311_p2, %p310_p1 }
   0x9   :  { %p313_p4 = pnand %p312_p3, %p306_p0 }
   0xb   :  { %316 = shalt.err (!%p313_p4)
}
   0xc   :  { %s364_s15 = smov 64   ;;  %s365_s16 = smov 4  }
   0xd   :  { %22 = dma.hbm_to_vmem [thread:$0]  %s409_s0, 256, %s17_s13, [#allocation3], %s364_s15, %s364_s15, %s365_s16  }
   0xe   :  { %s366_s19 = smov [#allocation5]  }
   0xf   :  { %s28_s20 = sshll.u32 %s366_s19, 4  ;;  %s29_s20 = int_to_ptr.vmem [resolvable:$true] %s28_s20 }
  0x10   :  { %s325_s21 = scalar_lea.vmem %s29_s20, 1024  ;;  %p330_p6 = scmp.lt.s32.totalorder %s29_s20, %s29_s20 }
  0x11   :  { %p326_p5 = scmp.ne.s32.totalorder %s29_s20, %s325_s21  ;;  %p331_p7 = scmp.lt.s32.totalorder %s325_s21, %s325_s21 }
  0x13   :  { %p332_p8 = por %p331_p7, %p330_p6 }
  0x15   :  { %p333_p9 = pnand %p332_p8, %p326_p5 }
  0x17   :  { %336 = shalt.err (!%p333_p9)
}
  0x18   :  { %34 = dma.hbm_to_vmem [thread:$0]  %s410_s1, 1024, %s29_s20, [#allocation6], %s364_s15, %s364_s15, %s365_s16  }
  0x19   :  { %357 = dma.done.wait [#allocation3], 256  }
  0x1a   :  { %358 = vsyncadd [#allocation3], 4294967040 }
  0x1b   :  { %359 = dma.done.wait [#allocation6], 1024  }
  0x1c   :  { %360 = vsyncadd [#allocation6], 4294966272  ;;  %v287_v0 = vld [vmem:[#allocation5 + $0x38] sm:$0xff]   ;;  %v288_v1 = vld [vmem:[#allocation5 + $0x30] sm:$0xff]   ;;  %s367_s24 = smov [#allocation7]  }
  0x1d   :  { %262 = vmatprep.subr.bf16.mxu0 %v287_v0  ;;  %v289_v2 = vld [vmem:[#allocation5 + $0x28] sm:$0xff]   ;;  %v290_v3 = vld [vmem:[#allocation5 + $0x20] sm:$0xff]   ;;  %v295_v4 = vld [vmem:[#allocation2] sm:$0xff]   ;;  %s209_s25 = sshll.u32 %s367_s24, 4  ;;  %s210_s25 = int_to_ptr.vmem [resolvable:$true] %s209_s25 }
  0x1e   :  { %263 = vmatpush3.bf16.msra.mxu0 %v287_v0  ;;  %278 = vmatprep.mubr.bf16.mxu0 %v295_v4  ;;  %v291_v5 = vld [vmem:[#allocation5 + $0x18] sm:$0xff]   ;;  %v292_v6 = vld [vmem:[#allocation5 + $0x10] sm:$0xff]   ;;  %v293_v7 = vld [vmem:[#allocation5 + $0x8] sm:$0xff]   ;;  %s337_s26 = scalar_lea.vmem %s210_s25, 256  ;;  %p342_p11 = scmp.lt.s32.totalorder %s210_s25, %s210_s25 }
  0x1f   :  { %264 = vmatprep.subr.bf16.mxu0 %v288_v1  ;;  %v294_v8 = vld [vmem:[#allocation5] sm:$0xff]   ;;  %v296_v9 = vld [vmem:[#allocation2 + $0x8] sm:$0xff]   ;;  %v222_v11 = vld [vmem:[%s411_s2] ss:$0 sm:$0xff]  ;;  %p338_p10 = scmp.ne.s32.totalorder %s210_s25, %s337_s26  ;;  %p343_p12 = scmp.lt.s32.totalorder %s337_s26, %s337_s26 }
  0x21   :  { %p344_p13 = por %p343_p12, %p342_p11 }
  0x22   :  { %265 = vmatpush3.bf16.msra.mxu0 %v288_v1 }
  0x23   :  { %266 = vmatprep.subr.bf16.mxu0 %v289_v2  ;;  %p345_p0 = pnand %p344_p13, %p338_p10 }
  0x26   :  { %267 = vmatpush3.bf16.msra.mxu0 %v289_v2 }
  0x27   :  { %268 = vmatprep.subr.bf16.mxu0 %v290_v3 }
  0x2a   :  { %269 = vmatpush3.bf16.msra.mxu0 %v290_v3 }
  0x2b   :  { %270 = vmatprep.subr.bf16.mxu0 %v291_v5 }
  0x2e   :  { %271 = vmatpush3.bf16.msra.mxu0 %v291_v5 }
  0x2f   :  { %272 = vmatprep.subr.bf16.mxu0 %v292_v6 }
  0x32   :  { %273 = vmatpush3.bf16.msra.mxu0 %v292_v6 }
  0x33   :  { %274 = vmatprep.subr.bf16.mxu0 %v293_v7 }
  0x36   :  { %275 = vmatpush3.bf16.msra.mxu0 %v293_v7 }
  0x37   :  { %276 = vmatprep.subr.bf16.mxu0 %v294_v8 }
  0x3a   :  { %277 = vmatpush3.bf16.msra.mxu0 %v294_v8 }
  0x3d   :  { %279 = vmatmul.mubr.bf16.vlgmr.msra.gmra.mxu0 %v296_v9 }
  0xfd   :  { %v280_v10 = vpop.f32.mrf.mxu0 }
  0xfe   :  { %v174_v13 = vadd.f32 %v280_v10, %v222_v11 }
  0xff   :  { %v165_v12 = vpop.f32.mrf.mxu0 }
 0x100   :  { %v166_v15 = vadd.f32 %v222_v11, %v165_v12  ;;  %v182_v18 = vmax.f32 %v174_v13, 0.0 }
 0x101   :  { %v281_v14 = vpop.f32.mrf.mxu0 }
 0x102   :  { %v177_v16 = vadd.f32 %v281_v14, %v222_v11  ;;  %v180_v21 = vmax.f32 %v166_v15, 0.0 }
 0x103   :  { %v168_v17 = vpop.f32.mrf.mxu0 }
 0x104   :  { %v183_v19 = vmax.f32 %v177_v16, 0.0  ;;  %v169_v20 = vadd.f32 %v222_v11, %v168_v17 }
 0x106   :  { %v249_v22 = vpack.c.bf16 %v183_v19, %v182_v18  ;;  %v181_v23 = vmax.f32 %v169_v20, 0.0 }
 0x108   :  { %251 = vst [vmem:[#allocation7 + $0x8] sm:$0xff] %v249_v22   ;;  %v244_v24 = vpack.c.bf16 %v181_v23, %v180_v21 }
 0x10a   :  { %245 = vst [vmem:[#allocation7] sm:$0xff] %v244_v24  }
 0x10b   :  { %348 = shalt.err (!%p345_p0)
}
 0x10c   :  { %215 = dma.vmem_to_hbm [thread:$0]  %s210_s25, 256, %s412_s3, [#allocation4], %s364_s15, %s364_s15, %s365_s16  }
 0x10d   :  { %361 = dma.done.wait [#allocation4], 256  }
 0x10e   :  { %362 = vsyncadd [#allocation4], 4294967040 }
 0x10f   :  { %219 = vsyncpa [#allocation3], 1 }
 0x110   :  { %220 = vsyncpa [#allocation6], 1 }
 0x111   :  { %221 = vsyncpa [#allocation4], 1 }

</bundles_post_ra>
